<compile_context>
chip_gen: v5e
topology: v5e:2x2
jax: 0.10.0
libtpu: 0.0.40
codegen_flags: <defaults>
</compile_context>

<pallas_src>
import jax
import jax.numpy as jnp
from jax.experimental import pallas as pl
from jax.experimental.pallas import tpu as pltpu


_LANE_CANDIDATES = (512, 256, 128)      # lane-dense last dims (multiples of 128)
_FALLBACK_LANES = 512                   # used only on the (rare) padded path
_TARGET_BLOCK_BYTES = 4 * 1024 * 1024   # ~4 MiB per operand per block
_VMEM_LIMIT_BYTES = 32 * 1024 * 1024    # 3 ops x 2 bufs x 4 MiB = 24 MiB < 32 MiB
_MIN_PALLAS_ELEMS = 64 * 1024           # below this, plain jnp add (XLA-fusable) wins


def _round_up(x: int, m: int) -> int:
    return ((x + m - 1) // m) * m


def _add_kernel(a_ref, b_ref, o_ref):
    o_ref[...] = a_ref[...] + b_ref[...]


def _pallas_add_2d(a2: jax.Array, b2: jax.Array, rows: int, lanes: int, sub: int) -> jax.Array:
    """Tiled elementwise add over a (rows, lanes) view."""
    itemsize = jnp.dtype(a2.dtype).itemsize

    # Block rows from a byte budget (same block bytes for f32 / bf16 / int8).
    tile_rows = _TARGET_BLOCK_BYTES // (lanes * itemsize)
    tile_rows = max(sub, (tile_rows // sub) * sub)
    tile_rows = min(tile_rows, _round_up(rows, sub))

    # Guarantee >= 2 grid steps so v7x's two TensorCores both get work.
    # (An odd step count leaves one TC with a trailing step; acceptable since
    #  shrinking blocks further would add per-step overhead on v5e/v6e.)
    if pl.cdiv(rows, tile_rows) < 2 and rows > sub:
        tile_rows = max(sub, _round_up(pl.cdiv(rows, 2), sub))

    grid = (pl.cdiv(rows, tile_rows),)
    spec = pl.BlockSpec((tile_rows, lanes), lambda i: (i, 0))

    return pl.pallas_call(
        _add_kernel,
        out_shape=jax.ShapeDtypeStruct((rows, lanes), a2.dtype),
        grid_spec=pltpu.PrefetchScalarGridSpec(
            num_scalar_prefetch=0,
            grid=grid,
            in_specs=[spec, spec],
            out_specs=spec,
        ),
        compiler_params=pltpu.CompilerParams(
            dimension_semantics=("parallel",),
            vmem_limit_bytes=_VMEM_LIMIT_BYTES,
        ),
    )(a2, b2)


def residual_add(x99: jax.Array, x85: jax.Array) -> jax.Array:
    """Computes x99 + x85 (NCHW residual add) with a Pallas TPU kernel."""
    assert x99.shape == x85.shape
    assert x99.dtype == x85.dtype
    orig_shape = x99.shape

    total = 1
    for d in orig_shape:
        total *= int(d)

    # Small-tensor fast path: launch overhead dominates, let XLA fuse the add.
    if total < _MIN_PALLAS_ELEMS:
        return x99 + x85

    # Sublane multiple depends on dtype packing (8 for 4B, 16 for 2B, 32 for 1B).
    itemsize = jnp.dtype(x99.dtype).itemsize
    sub = 8 * max(1, 4 // itemsize)

    # Prefer a lane width that divides the element count exactly -> zero padding.
    lanes = None
    for cand in _LANE_CANDIDATES:
        if total % cand == 0:
            lanes = cand
            break

    if lanes is not None:
        rows = total // lanes
        out2 = _pallas_add_2d(
            x99.reshape(rows, lanes), x85.reshape(rows, lanes), rows, lanes, sub
        )
        return out2.reshape(orig_shape)

    # Rare fallback for totals not divisible by 128: pad + slice (extra HBM copies).
    lanes = _FALLBACK_LANES
    rows = pl.cdiv(total, lanes)
    pad = rows * lanes - total
    a_flat = jnp.pad(x99.reshape(-1), (0, pad))
    b_flat = jnp.pad(x85.reshape(-1), (0, pad))
    out2 = _pallas_add_2d(
        a_flat.reshape(rows, lanes), b_flat.reshape(rows, lanes), rows, lanes, sub
    )
    return out2.reshape(-1)[:total].reshape(orig_shape)


if __name__ == "__main__":
    key = jax.random.PRNGKey(0)

    # 1) Exact module shape (1, 40, 56, 56): 125440 elems, divisible by 512
    #    -> zero-pad-free Pallas path, 2-step parallel grid.
    k1, k2 = jax.random.split(key)
    shape = (1, 40, 56, 56)
    x99 = jax.random.normal(k1, shape, dtype=jnp.float32)
    x85 = jax.random.normal(k2, shape, dtype=jnp.float32)
    out = residual_add(x99, x85)
    jax.block_until_ready(out)
    ref = x99 + x85
    assert out.shape == ref.shape
    assert jnp.allclose(out, ref, atol=1e-6, rtol=1e-6)

    # 2) Tiny tensor -> small-size fast path (plain jnp add).
    k3, k4 = jax.random.split(jax.random.PRNGKey(1))
    a_s = jax.random.normal(k3, (2, 4, 16, 16), dtype=jnp.float32)
    b_s = jax.random.normal(k4, (2, 4, 16, 16), dtype=jnp.float32)
    out_s = residual_add(a_s, b_s)
    jax.block_until_ready(out_s)
    assert jnp.allclose(out_s, a_s + b_s, atol=1e-6, rtol=1e-6)

    # 3) Awkward large total (not divisible by 128) -> padded fallback path.
    k5, k6 = jax.random.split(jax.random.PRNGKey(2))
    a_p = jax.random.normal(k5, (1, 3, 171, 257), dtype=jnp.float32)
    b_p = jax.random.normal(k6, (1, 3, 171, 257), dtype=jnp.float32)
    out_p = residual_add(a_p, b_p)
    jax.block_until_ready(out_p)
    assert jnp.allclose(out_p, a_p + b_p, atol=1e-6, rtol=1e-6)

    # 4) bf16 at the module shape (exercises sub=16 packing, 4 MiB byte budget).
    a_h = x99.astype(jnp.bfloat16)
    b_h = x85.astype(jnp.bfloat16)
    out_h = residual_add(a_h, b_h)
    jax.block_until_ready(out_h)
    assert jnp.allclose(out_h.astype(jnp.float32), (a_h + b_h).astype(jnp.float32),
                        atol=1e-2, rtol=1e-2)

    print("KERNEL_OK")
</pallas_src>

<mosaic_0001>
module attributes {stable_mosaic.version = 11 : i64} {
  func.func @_add_kernel(%arg0: i32, %arg1: memref<128x512xf32, #tpu.memory_space<vmem>>, %arg2: memref<128x512xf32, #tpu.memory_space<vmem>>, %arg3: memref<128x512xf32, #tpu.memory_space<vmem>>) attributes {dimension_semantics = [#tpu.dimension_semantics<parallel>], iteration_bounds = array<i64: 2>, scalar_prefetch = 0 : i64, scratch_operands = 0 : i64, tpu.core_type = #tpu.core_type<tc>, window_params = [{transform_indices = @transform_0, window_bounds = array<i64: 128, 512>}, {transform_indices = @transform_1, window_bounds = array<i64: 128, 512>}, {transform_indices = @transform_2, window_bounds = array<i64: 128, 512>}]} {
    %c0 = arith.constant 0 : index
    %c0_0 = arith.constant 0 : index
    %0 = vector.load %arg1[%c0, %c0_0] : memref<128x512xf32, #tpu.memory_space<vmem>>, vector<128x512xf32>
    %c0_1 = arith.constant 0 : index
    %c0_2 = arith.constant 0 : index
    %1 = vector.load %arg2[%c0_1, %c0_2] : memref<128x512xf32, #tpu.memory_space<vmem>>, vector<128x512xf32>
    %2 = arith.addf %0, %1 : vector<128x512xf32>
    %c0_3 = arith.constant 0 : index
    %c0_4 = arith.constant 0 : index
    %3 = vector.load %arg3[%c0_3, %c0_4] : memref<128x512xf32, #tpu.memory_space<vmem>>, vector<128x512xf32>
    tpu.vector_store %arg3[%c0_3, %c0_4], %2 {strides = array<i32>} : memref<128x512xf32, #tpu.memory_space<vmem>>, vector<128x512xf32>,
    return
  }
  func.func @transform_0(%arg0: i32) -> (i32, i32) {
    %c0_i32 = arith.constant 0 : i32
    %c0_i32_0 = arith.constant 0 : i32
    return %arg0, %c0_i32 : i32, i32
  }
  func.func @transform_1(%arg0: i32) -> (i32, i32) {
    %c0_i32 = arith.constant 0 : i32
    %c0_i32_0 = arith.constant 0 : i32
    return %arg0, %c0_i32 : i32, i32
  }
  func.func @transform_2(%arg0: i32) -> (i32, i32) {
    %c0_i32 = arith.constant 0 : i32
    %c0_i32_0 = arith.constant 0 : i32
    return %arg0, %c0_i32 : i32, i32
  }
}

</mosaic_0001>

<bundles_post_ra>
// kernel: tpu_custom_call.1
= control target key start
LH: loop header
LB: loop body
LE: loop exit
PB: predicated region body
PF: predicated region fallthrough
CT: control target
= control target key end

     0   :  { %7 = vsyncpa [#allocation3], 0  ;;  %s1325_s0 = inlined_call_operand.hbm [shape: f32[245,512], index: 0, kind: input, shape index: {}]   ;;  %s1326_s1 = inlined_call_operand.hbm [shape: f32[245,512], index: 1, kind: input, shape index: {}]   ;;  %s1327_s2 = inlined_call_operand.hbm [shape: f32[245,512], index: 2, kind: output, shape index: {}]  }
   0x1   :  { %9 = vsyncpa [#allocation3 + $0x1], 0 }
   0x2   :  { %10 = vsyncpa [#allocation6], 0 }
   0x3   :  { %12 = vsyncpa [#allocation6 + $0x1], 0 }
   0x4   :  { %13 = vsyncpa [#allocation4], 0 }
   0x5   :  { %15 = vsyncpa [#allocation4 + $0x1], 0  ;;  %s895_s9 = smov 0   ;;  %s897_s10 = smov 0  }
   0x6   :  { %s899_s11 = smov 0   ;;  %s901_s12 = smov 0  }
   0x7 LB: > { %s916_s13 = sadd.s32 4294967295, %s869_s12   ;;  %s619_s14 = sadd.s32 4294967294, %s869_s12   ;;  %s869_s12 = sphi %s901_s12, %s1341_s12   ;;  %s865_s11 = sphi %s899_s11, %s1340_s11   ;;  %s861_s10 = sphi %s897_s10, %s1339_s10   ;;  %s857_s9 = sphi %s895_s9, %s1338_s9  }
   0x8   : > { %s920_s15 = sadd.s32 1, %s869_s12   ;;  %s28_s16 = sadd.s32 1, %s865_s11 }
   0x9   : > { %s25_s17 = ssub.s32 %s869_s12, %s920_s15  ;;  %p35_p0 = scmp.ne.s32.totalorder %s865_s11, %s861_s10 }
   0xa   : > { %p26_p1 = scmp.eq.s32.totalorder %s25_s17, 0  ;;  %p36_p2 = scmp.eq.s32.totalorder %s869_s12, 0 }
   0xb   : > { %p41_p3 = scmp.ne.s32.totalorder %s861_s10, %s857_s9  ;;  %p42_p4 = scmp.eq.s32.totalorder %s916_s13, 0 }
   0xc   : > { %s932_s18 = scalar_select %p26_p1, %s865_s11, %s28_s16  }
   0xd   : > { %p934_p5 = por %p36_p2, %p35_p0  ;;  %p938_p6 = por %p42_p4, %p41_p3 }
   0xe   : > { %p91_p7 = scmp.eq.s32.totalorder %s916_s13, 1  ;;  %p97_p8 = scmp.eq.s32.totalorder %s619_s14, 1 }
   0xf   : > { %p1328_p11 = scmp.ge.s32.totalorder %s869_s12, 2 }
  0x10   : > { %p943_p9 = por %p91_p7, %p35_p0  ;;  %p947_p10 = por %p97_p8, %p41_p3 }
  0x11   : > { %113 = sbr.rel (%p1328_p11) target bundleno = 94 (0x5e), region = 16 }
  0x12   : > { %s1332_s22 = scalar_select %p947_p10, 1, 0 }
  0x16   : > { %116 = sbr.rel (!%p934_p5) target bundleno = 58 (0x3a), region = 20  ;;  %s117_s23 = sand.u32 (%p934_p5), 1, %s865_s11  }
  0x17   : > { %s623_s24 = sshll.u32 (%p934_p5), %s869_s12, 4  ;;  %s622_s25 = sshll.u32 (%p934_p5), %s117_s23, 9 }
  0x18   : > { %s123_s26 = ssub.s32 (%p934_p5), 31, %s623_s24  ;;  %s961_s30 = scalar_lea.sflag (%p934_p5), [#allocation3], %s117_s23 }
  0x19   : > { %p124_p12 = scmp.lt.s32.totalorder (%p934_p5), %s123_s26, 16  ;;  %s121_s3 = scalar_lea.vmem (%p934_p5), [#allocation2], %s622_s25 }
  0x1b   : > { %s1343_s26 = smov (!%p124_p12, %s123_s26), 16 }
  0x1c   : > { %s655_s27 = sshll.u32 %s1343_s26, 5 }
  0x1d   : > { %s128_s28 = ssub.s32 512, %s655_s27 }
  0x1e   : > { %s129_s29 = sshll.u32 %s128_s28, 4 }
  0x1f   : > { %130 = vsyncadd %s961_s30, %s129_s29  ;;  %p964_p13 = scmp.ne.s32.totalorder %s655_s27, 0  ;;  %s657_s5 = sshll.u32 %s869_s12, 9 }
  0x20   : > { %s134_s8 = scalar_lea.hbm %s1325_s0, %s657_s5  ;;  %s972_s14 = sshll.u32 %s121_s3, 4  ;;  %s139_s14 = int_to_ptr.vmem [resolvable:$true] %s972_s14 }
  0x21   : > { %s136_s16 = sshll.u32 %s134_s8, 4  ;;  %s630_s17 = sshll.u32 %s1343_s26, 9  ;;  %s975_s16 = int_to_ptr.hbm [resolvable:$true] %s136_s16 }
  0x22   : > { %s710_s23 = sshra.s32 %s975_s16, 4  ;;  %s712_s24 = sshrl.u32 %s630_s17, 4  ;;  %s711_s23 = int_to_ptr.hbm [resolvable:$true] %s710_s23 }
  0x23   : > { %s717_s25 = scalar_lea.hbm %s711_s23, %s712_s24  ;;  %s721_s29 = scalar_lea.hbm %s1325_s0, 992 }
  0x24   : > { %p718_p0 = scmp.ne.s32.totalorder %s711_s23, %s717_s25  ;;  %p722_p3 = scmp.lt.s32.totalorder %s711_s23, %s1325_s0 }
  0x25   : > { %p723_p4 = scmp.lt.s32.totalorder %s721_s29, %s717_s25 }
  0x26   : > { %p719_p1 = pnand %p718_p0, %p964_p13 }
  0x27   : > { %p724_p7 = por %p723_p4, %p722_p3 }
  0x28   : > { %p720_p2 = pneg %p719_p1 }
  0x2a   : > { %p725_p8 = pnand %p724_p7, %p720_p2 }
  0x2c   : > { %728 = shalt.err (!%p725_p8)
}
  0x2d   : > { %s729_s6 = sshra.s32 %s139_s14, 4  ;;  %s871_s8 = smov [#allocation2]   ;;  %s730_s6 = int_to_ptr.vmem [resolvable:$true] %s729_s6 }
  0x2e   : > { %s736_s7 = scalar_lea.vmem %s730_s6, %s712_s24  ;;  %s740_s27 = scalar_lea.vmem %s871_s8, 1024 }
  0x2f   : > { %p737_p12 = scmp.ne.s32.totalorder %s730_s6, %s736_s7  ;;  %p742_p11 = scmp.lt.s32.totalorder %s740_s27, %s736_s7 }
  0x31   : > { %p738_p0 = pnand %p737_p12, %p964_p13 }
  0x33   : > { %p739_p1 = pneg %p738_p0 }
  0x35   : > { %p744_p10 = pnand %p742_p11, %p739_p1 }
  0x37   : > { %747 = shalt.err (!%p744_p10)
}
  0x38   : > { %s872_s23 = smov 512   ;;  %s873_s25 = smov 32  }
  0x39   : > { %144 = dma.hbm_to_vmem [thread:$0]  (%p964_p13), %s975_s16, %s630_s17, %s139_s14, %s961_s30, %s872_s23, %s872_s23, %s873_s25  }
  0x3a PF: > { %147 = sbr.rel (!%p934_p5) target bundleno = 94 (0x5e), region = 24  ;;  %s148_s24 = sand.u32 (%p934_p5), 1, %s865_s11  }
  0x3b   : > { %s632_s28 = sshll.u32 (%p934_p5), %s869_s12, 4  ;;  %s631_s29 = sshll.u32 (%p934_p5), %s148_s24, 9 }
  0x3c   : > { %s154_s3 = ssub.s32 (%p934_p5), 31, %s632_s28  ;;  %s1008_s7 = scalar_lea.sflag (%p934_p5), [#allocation6], %s148_s24 }
  0x3d   : > { %p155_p10 = scmp.lt.s32.totalorder (%p934_p5), %s154_s3, 16  ;;  %s152_s26 = scalar_lea.vmem (%p934_p5), [#allocation5], %s631_s29 }
  0x3f   : > { %s1345_s3 = smov (!%p155_p10, %s154_s3), 16 }
  0x40   : > { %s658_s5 = sshll.u32 %s1345_s3, 5 }
  0x41   : > { %s159_s6 = ssub.s32 512, %s658_s5 }
  0x42   : > { %s160_s4 = sshll.u32 %s159_s6, 4 }
  0x43   : > { %161 = vsyncadd %s1008_s7, %s160_s4  ;;  %p1011_p5 = scmp.ne.s32.totalorder %s658_s5, 0  ;;  %s660_s30 = sshll.u32 %s869_s12, 9 }
  0x44   : > { %s165_s17 = scalar_lea.hbm %s1326_s1, %s660_s30  ;;  %s1019_s8 = sshll.u32 %s152_s26, 4  ;;  %s170_s8 = int_to_ptr.vmem [resolvable:$true] %s1019_s8 }
  0x45   : > { %s167_s27 = sshll.u32 %s165_s17, 4  ;;  %s639_s23 = sshll.u32 %s1345_s3, 9  ;;  %s1022_s27 = int_to_ptr.hbm [resolvable:$true] %s167_s27 }
  0x46   : > { %s749_s25 = sshra.s32 %s1022_s27, 4  ;;  %s751_s24 = sshrl.u32 %s639_s23, 4  ;;  %s750_s25 = int_to_ptr.hbm [resolvable:$true] %s749_s25 }
  0x47   : > { %s756_s28 = scalar_lea.hbm %s750_s25, %s751_s24  ;;  %s760_s6 = scalar_lea.hbm %s1326_s1, 992 }
  0x48   : > { %p757_p11 = scmp.ne.s32.totalorder %s750_s25, %s756_s28  ;;  %p761_p3 = scmp.lt.s32.totalorder %s750_s25, %s1326_s1 }
  0x49   : > { %p762_p4 = scmp.lt.s32.totalorder %s760_s6, %s756_s28 }
  0x4a   : > { %p758_p13 = pnand %p757_p11, %p1011_p5 }
  0x4b   : > { %p763_p7 = por %p762_p4, %p761_p3 }
  0x4c   : > { %p759_p2 = pneg %p758_p13 }
  0x4e   : > { %p764_p8 = pnand %p763_p7, %p759_p2 }
  0x50   : > { %767 = shalt.err (!%p764_p8)
}
  0x51   : > { %s768_s30 = sshra.s32 %s170_s8, 4  ;;  %s874_s16 = smov [#allocation5]   ;;  %s769_s30 = int_to_ptr.vmem [resolvable:$true] %s768_s30 }
  0x52   : > { %s775_s14 = scalar_lea.vmem %s769_s30, %s751_s24  ;;  %s779_s17 = scalar_lea.vmem %s874_s16, 1024 }
  0x53   : > { %p776_p12 = scmp.ne.s32.totalorder %s769_s30, %s775_s14  ;;  %p781_p10 = scmp.lt.s32.totalorder %s779_s17, %s775_s14 }
  0x55   : > { %p777_p0 = pnand %p776_p12, %p1011_p5 }
  0x57   : > { %p778_p1 = pneg %p777_p0 }
  0x59   : > { %p783_p11 = pnand %p781_p10, %p778_p1 }
  0x5b   : > { %786 = shalt.err (!%p783_p11)
}
  0x5c   : > { %s875_s25 = smov 512   ;;  %s876_s28 = smov 32  }
  0x5d   : > { %175 = dma.hbm_to_vmem [thread:$0]  (%p1011_p5), %s1022_s27, %s639_s23, %s170_s8, %s1008_s7, %s875_s25, %s875_s25, %s876_s28  }
  0x5e PF: > { %p640_p13 = scmp.ge.s32.totalorder %s869_s12, 1  ;;  %p177_p2 = scmp.lt.s32.totalorder %s869_s12, 3 }
  0x60   : > { %p178_p3 = pnand %p640_p13, %p177_p2 }
  0x61   : > { %s1051_s24 = sand.u32 (!%p178_p3), 1, %s861_s10  }
  0x62   : > { %181 = sbr.rel (%p178_p3) target bundleno = 205 (0xcd), region = 28  ;;  %s641_s29 = sshll.u32 (!%p178_p3), %s1051_s24, 9 }
  0x63   : > { %s184_s5 = scalar_lea.sflag (!%p178_p3), [#allocation3], %s1051_s24  ;;  %s1055_s19 = scalar_lea.vmem (!%p178_p3), [#allocation2], %s641_s29 }
  0x67   : > { %844 = dma.done.wait (%p938_p6), %s184_s5, 8192  }
  0x68   : > { %846 = vsyncadd (%p938_p6), %s184_s5, 4294959104  ;;  %s194_s3 = scalar_lea.sflag [#allocation6], %s1051_s24  ;;  %s1062_s7 = scalar_lea.vmem [#allocation5], %s641_s29 }
  0x69   : > { %848 = dma.done.wait (%p938_p6), %s194_s3, 8192  }
  0x6a   : > { %850 = vsyncadd (%p938_p6), %s194_s3, 4294959104  ;;  %v242_v0 = vld [vmem:[%s1055_s19] sm:$0xff]  ;;  %v243_v2 = vld [vmem:[%s1055_s19 + $0x8] sm:$0xff]  ;;  %s1077_s20 = scalar_lea.vmem [#allocation7], %s641_s29  ;;  %s499_s8 = scalar_lea.sflag [#allocation4], %s1051_s24 }
  0x6b   : > { %v306_v1 = vld [vmem:[%s1062_s7] sm:$0xff]  ;;  %v307_v4 = vld [vmem:[%s1062_s7 + $0x8] sm:$0xff]  ;;  %v244_v5 = vld [vmem:[%s1055_s19 + $0x10] sm:$0xff]  ;;  %s645_s27 = sshll.u32 (%p943_p9), %s916_s13, 4 }
  0x6c   : > { %v370_v3 = vadd.f32 %v306_v1, %v242_v0  ;;  %v308_v6 = vld [vmem:[%s1062_s7 + $0x10] sm:$0xff]  ;;  %v371_v7 = vadd.f32 %v307_v4, %v243_v2  ;;  %v245_v9 = vld [vmem:[%s1055_s19 + $0x18] sm:$0xff]  ;;  %v246_v11 = vld [vmem:[%s1055_s19 + $0x20] sm:$0xff]  ;;  %s507_s23 = ssub.s32 (%p943_p9), 31, %s645_s27 }
  0x6d   : > { %v372_v8 = vadd.f32 %v308_v6, %v244_v5  ;;  %v309_v10 = vld [vmem:[%s1062_s7 + $0x18] sm:$0xff]  ;;  %v310_v13 = vld [vmem:[%s1062_s7 + $0x20] sm:$0xff]  ;;  %v247_v14 = vld [vmem:[%s1055_s19 + $0x28] sm:$0xff]  ;;  %p508_p6 = scmp.lt.s32.totalorder (%p943_p9), %s507_s23, 16 }
  0x6e   : > { %434 = vst [vmem:[%s1077_s20] sm:$0xff] %v370_v3  ;;  %v373_v12 = vadd.f32 %v309_v10, %v245_v9  ;;  %v311_v15 = vld [vmem:[%s1062_s7 + $0x28] sm:$0xff]  ;;  %v374_v16 = vadd.f32 %v310_v13, %v246_v11  ;;  %v248_v18 = vld [vmem:[%s1055_s19 + $0x30] sm:$0xff]  ;;  %v249_v20 = vld [vmem:[%s1055_s19 + $0x38] sm:$0xff] }
  0x6f   : > { %435 = vst [vmem:[%s1077_s20 + $0x8] sm:$0xff] %v371_v7  ;;  %v375_v17 = vadd.f32 %v311_v15, %v247_v14  ;;  %v312_v19 = vld [vmem:[%s1062_s7 + $0x30] sm:$0xff]  ;;  %v313_v22 = vld [vmem:[%s1062_s7 + $0x38] sm:$0xff]  ;;  %v250_v23 = vld [vmem:[%s1055_s19 + $0x40] sm:$0xff] }
  0x70   : > { %436 = vst [vmem:[%s1077_s20 + $0x10] sm:$0xff] %v372_v8  ;;  %v376_v21 = vadd.f32 %v312_v19, %v248_v18  ;;  %v314_v24 = vld [vmem:[%s1062_s7 + $0x40] sm:$0xff]  ;;  %v377_v25 = vadd.f32 %v313_v22, %v249_v20  ;;  %v251_v26 = vld [vmem:[%s1055_s19 + $0x48] sm:$0xff]  ;;  %v252_v28 = vld [vmem:[%s1055_s19 + $0x50] sm:$0xff] }
  0x71   : > { %437 = vst [vmem:[%s1077_s20 + $0x18] sm:$0xff] %v373_v12  ;;  %v315_v27 = vld [vmem:[%s1062_s7 + $0x48] sm:$0xff]  ;;  %v378_v29 = vadd.f32 %v314_v24, %v250_v23  ;;  %v316_v30 = vld [vmem:[%s1062_s7 + $0x50] sm:$0xff]  ;;  %v253_v31 = vld [vmem:[%s1055_s19 + $0x58] sm:$0xff] }
  0x72   : > { %438 = vst [vmem:[%s1077_s20 + $0x20] sm:$0xff] %v374_v16  ;;  %v317_v32 = vld [vmem:[%s1062_s7 + $0x58] sm:$0xff]  ;;  %v379_v33 = vadd.f32 %v315_v27, %v251_v26  ;;  %v254_v34 = vld [vmem:[%s1055_s19 + $0x60] sm:$0xff]  ;;  %v380_v36 = vadd.f32 %v316_v30, %v252_v28  ;;  %v255_v37 = vld [vmem:[%s1055_s19 + $0x68] sm:$0xff] }
  0x73   : > { %439 = vst [vmem:[%s1077_s20 + $0x28] sm:$0xff] %v375_v17  ;;  %v318_v35 = vld [vmem:[%s1062_s7 + $0x60] sm:$0xff]  ;;  %v319_v38 = vld [vmem:[%s1062_s7 + $0x68] sm:$0xff]  ;;  %v381_v39 = vadd.f32 %v317_v32, %v253_v31  ;;  %v256_v40 = vld [vmem:[%s1055_s19 + $0x70] sm:$0xff] }
  0x74   : > { %440 = vst [vmem:[%s1077_s20 + $0x30] sm:$0xff] %v376_v21  ;;  %v320_v41 = vld [vmem:[%s1062_s7 + $0x70] sm:$0xff]  ;;  %v382_v42 = vadd.f32 %v318_v35, %v254_v34  ;;  %v257_v43 = vld [vmem:[%s1055_s19 + $0x78] sm:$0xff]  ;;  %v383_v45 = vadd.f32 %v319_v38, %v255_v37  ;;  %v258_v46 = vld [vmem:[%s1055_s19 + $0x80] sm:$0xff] }
  0x75   : > { %441 = vst [vmem:[%s1077_s20 + $0x38] sm:$0xff] %v377_v25  ;;  %v321_v44 = vld [vmem:[%s1062_s7 + $0x78] sm:$0xff]  ;;  %v322_v47 = vld [vmem:[%s1062_s7 + $0x80] sm:$0xff]  ;;  %v384_v48 = vadd.f32 %v320_v41, %v256_v40  ;;  %v259_v49 = vld [vmem:[%s1055_s19 + $0x88] sm:$0xff] }
  0x76   : > { %442 = vst [vmem:[%s1077_s20 + $0x40] sm:$0xff] %v378_v29  ;;  %v323_v50 = vld [vmem:[%s1062_s7 + $0x88] sm:$0xff]  ;;  %v385_v51 = vadd.f32 %v321_v44, %v257_v43  ;;  %v260_v52 = vld [vmem:[%s1055_s19 + $0x90] sm:$0xff]  ;;  %v386_v54 = vadd.f32 %v322_v47, %v258_v46  ;;  %v261_v55 = vld [vmem:[%s1055_s19 + $0x98] sm:$0xff] }
  0x77   : > { %443 = vst [vmem:[%s1077_s20 + $0x48] sm:$0xff] %v379_v33  ;;  %v324_v53 = vld [vmem:[%s1062_s7 + $0x90] sm:$0xff]  ;;  %v325_v56 = vld [vmem:[%s1062_s7 + $0x98] sm:$0xff]  ;;  %v387_v57 = vadd.f32 %v323_v50, %v259_v49  ;;  %v262_v58 = vld [vmem:[%s1055_s19 + $0xa0] sm:$0xff] }
  0x78   : > { %444 = vst [vmem:[%s1077_s20 + $0x50] sm:$0xff] %v380_v36  ;;  %v326_v59 = vld [vmem:[%s1062_s7 + $0xa0] sm:$0xff]  ;;  %v388_v60 = vadd.f32 %v324_v53, %v260_v52  ;;  %v263_v61 = vld [vmem:[%s1055_s19 + $0xa8] sm:$0xff]  ;;  %v389_v63 = vadd.f32 %v325_v56, %v261_v55  ;;  %v264_v0 = vld [vmem:[%s1055_s19 + $0xb0] sm:$0xff] }
  0x79   : > { %445 = vst [vmem:[%s1077_s20 + $0x58] sm:$0xff] %v381_v39  ;;  %v327_v62 = vld [vmem:[%s1062_s7 + $0xa8] sm:$0xff]  ;;  %v328_v1 = vld [vmem:[%s1062_s7 + $0xb0] sm:$0xff]  ;;  %v390_v2 = vadd.f32 %v326_v59, %v262_v58  ;;  %v265_v3 = vld [vmem:[%s1055_s19 + $0xb8] sm:$0xff] }
  0x7a   : > { %446 = vst [vmem:[%s1077_s20 + $0x60] sm:$0xff] %v382_v42  ;;  %v329_v4 = vld [vmem:[%s1062_s7 + $0xb8] sm:$0xff]  ;;  %v391_v5 = vadd.f32 %v327_v62, %v263_v61  ;;  %v266_v6 = vld [vmem:[%s1055_s19 + $0xc0] sm:$0xff]  ;;  %v392_v8 = vadd.f32 %v328_v1, %v264_v0  ;;  %v267_v9 = vld [vmem:[%s1055_s19 + $0xc8] sm:$0xff] }
  0x7b   : > { %447 = vst [vmem:[%s1077_s20 + $0x68] sm:$0xff] %v383_v45  ;;  %v330_v7 = vld [vmem:[%s1062_s7 + $0xc0] sm:$0xff]  ;;  %v331_v10 = vld [vmem:[%s1062_s7 + $0xc8] sm:$0xff]  ;;  %v393_v11 = vadd.f32 %v329_v4, %v265_v3  ;;  %v268_v12 = vld [vmem:[%s1055_s19 + $0xd0] sm:$0xff] }
  0x7c   : > { %448 = vst [vmem:[%s1077_s20 + $0x70] sm:$0xff] %v384_v48  ;;  %v332_v13 = vld [vmem:[%s1062_s7 + $0xd0] sm:$0xff]  ;;  %v394_v14 = vadd.f32 %v330_v7, %v266_v6  ;;  %v269_v15 = vld [vmem:[%s1055_s19 + $0xd8] sm:$0xff]  ;;  %v395_v17 = vadd.f32 %v331_v10, %v267_v9  ;;  %v270_v18 = vld [vmem:[%s1055_s19 + $0xe0] sm:$0xff] }
  0x7d   : > { %449 = vst [vmem:[%s1077_s20 + $0x78] sm:$0xff] %v385_v51  ;;  %v333_v16 = vld [vmem:[%s1062_s7 + $0xd8] sm:$0xff]  ;;  %v334_v19 = vld [vmem:[%s1062_s7 + $0xe0] sm:$0xff]  ;;  %v396_v20 = vadd.f32 %v332_v13, %v268_v12  ;;  %v271_v21 = vld [vmem:[%s1055_s19 + $0xe8] sm:$0xff] }
  0x7e   : > { %450 = vst [vmem:[%s1077_s20 + $0x80] sm:$0xff] %v386_v54  ;;  %v335_v22 = vld [vmem:[%s1062_s7 + $0xe8] sm:$0xff]  ;;  %v397_v23 = vadd.f32 %v333_v16, %v269_v15  ;;  %v272_v24 = vld [vmem:[%s1055_s19 + $0xf0] sm:$0xff]  ;;  %v398_v26 = vadd.f32 %v334_v19, %v270_v18  ;;  %v273_v27 = vld [vmem:[%s1055_s19 + $0xf8] sm:$0xff] }
  0x7f   : > { %451 = vst [vmem:[%s1077_s20 + $0x88] sm:$0xff] %v387_v57  ;;  %v336_v25 = vld [vmem:[%s1062_s7 + $0xf0] sm:$0xff]  ;;  %v337_v28 = vld [vmem:[%s1062_s7 + $0xf8] sm:$0xff]  ;;  %v399_v29 = vadd.f32 %v335_v22, %v271_v21  ;;  %v274_v30 = vld [vmem:[%s1055_s19 + $0x100] sm:$0xff] }
  0x80   : > { %452 = vst [vmem:[%s1077_s20 + $0x90] sm:$0xff] %v388_v60  ;;  %v338_v31 = vld [vmem:[%s1062_s7 + $0x100] sm:$0xff]  ;;  %v400_v32 = vadd.f32 %v336_v25, %v272_v24  ;;  %v275_v33 = vld [vmem:[%s1055_s19 + $0x108] sm:$0xff]  ;;  %v401_v35 = vadd.f32 %v337_v28, %v273_v27  ;;  %v276_v36 = vld [vmem:[%s1055_s19 + $0x110] sm:$0xff] }
  0x81   : > { %453 = vst [vmem:[%s1077_s20 + $0x98] sm:$0xff] %v389_v63  ;;  %v339_v34 = vld [vmem:[%s1062_s7 + $0x108] sm:$0xff]  ;;  %v340_v37 = vld [vmem:[%s1062_s7 + $0x110] sm:$0xff]  ;;  %v402_v38 = vadd.f32 %v338_v31, %v274_v30  ;;  %v277_v39 = vld [vmem:[%s1055_s19 + $0x118] sm:$0xff] }
  0x82   : > { %454 = vst [vmem:[%s1077_s20 + $0xa0] sm:$0xff] %v390_v2  ;;  %v341_v40 = vld [vmem:[%s1062_s7 + $0x118] sm:$0xff]  ;;  %v403_v41 = vadd.f32 %v339_v34, %v275_v33  ;;  %v278_v42 = vld [vmem:[%s1055_s19 + $0x120] sm:$0xff]  ;;  %v404_v44 = vadd.f32 %v340_v37, %v276_v36  ;;  %v279_v45 = vld [vmem:[%s1055_s19 + $0x128] sm:$0xff] }
  0x83   : > { %455 = vst [vmem:[%s1077_s20 + $0xa8] sm:$0xff] %v391_v5  ;;  %v342_v43 = vld [vmem:[%s1062_s7 + $0x120] sm:$0xff]  ;;  %v343_v46 = vld [vmem:[%s1062_s7 + $0x128] sm:$0xff]  ;;  %v405_v47 = vadd.f32 %v341_v40, %v277_v39  ;;  %v280_v48 = vld [vmem:[%s1055_s19 + $0x130] sm:$0xff] }
  0x84   : > { %456 = vst [vmem:[%s1077_s20 + $0xb0] sm:$0xff] %v392_v8  ;;  %v344_v49 = vld [vmem:[%s1062_s7 + $0x130] sm:$0xff]  ;;  %v406_v50 = vadd.f32 %v342_v43, %v278_v42  ;;  %v281_v51 = vld [vmem:[%s1055_s19 + $0x138] sm:$0xff]  ;;  %v407_v53 = vadd.f32 %v343_v46, %v279_v45  ;;  %v282_v54 = vld [vmem:[%s1055_s19 + $0x140] sm:$0xff] }
  0x85   : > { %457 = vst [vmem:[%s1077_s20 + $0xb8] sm:$0xff] %v393_v11  ;;  %v345_v52 = vld [vmem:[%s1062_s7 + $0x138] sm:$0xff]  ;;  %v346_v55 = vld [vmem:[%s1062_s7 + $0x140] sm:$0xff]  ;;  %v408_v56 = vadd.f32 %v344_v49, %v280_v48  ;;  %v283_v57 = vld [vmem:[%s1055_s19 + $0x148] sm:$0xff] }
  0x86   : > { %458 = vst [vmem:[%s1077_s20 + $0xc0] sm:$0xff] %v394_v14  ;;  %v347_v58 = vld [vmem:[%s1062_s7 + $0x148] sm:$0xff]  ;;  %v409_v59 = vadd.f32 %v345_v52, %v281_v51  ;;  %v284_v60 = vld [vmem:[%s1055_s19 + $0x150] sm:$0xff]  ;;  %v410_v62 = vadd.f32 %v346_v55, %v282_v54  ;;  %v285_v63 = vld [vmem:[%s1055_s19 + $0x158] sm:$0xff] }
  0x87   : > { %459 = vst [vmem:[%s1077_s20 + $0xc8] sm:$0xff] %v395_v17  ;;  %v348_v61 = vld [vmem:[%s1062_s7 + $0x150] sm:$0xff]  ;;  %v349_v0 = vld [vmem:[%s1062_s7 + $0x158] sm:$0xff]  ;;  %v411_v1 = vadd.f32 %v347_v58, %v283_v57  ;;  %v286_v2 = vld [vmem:[%s1055_s19 + $0x160] sm:$0xff] }
  0x88   : > { %460 = vst [vmem:[%s1077_s20 + $0xd0] sm:$0xff] %v396_v20  ;;  %v350_v3 = vld [vmem:[%s1062_s7 + $0x160] sm:$0xff]  ;;  %v412_v4 = vadd.f32 %v348_v61, %v284_v60  ;;  %v287_v5 = vld [vmem:[%s1055_s19 + $0x168] sm:$0xff]  ;;  %v413_v7 = vadd.f32 %v349_v0, %v285_v63  ;;  %v288_v8 = vld [vmem:[%s1055_s19 + $0x170] sm:$0xff] }
  0x89   : > { %461 = vst [vmem:[%s1077_s20 + $0xd8] sm:$0xff] %v397_v23  ;;  %v351_v6 = vld [vmem:[%s1062_s7 + $0x168] sm:$0xff]  ;;  %v352_v9 = vld [vmem:[%s1062_s7 + $0x170] sm:$0xff]  ;;  %v414_v10 = vadd.f32 %v350_v3, %v286_v2  ;;  %v289_v11 = vld [vmem:[%s1055_s19 + $0x178] sm:$0xff] }
  0x8a   : > { %462 = vst [vmem:[%s1077_s20 + $0xe0] sm:$0xff] %v398_v26  ;;  %v353_v12 = vld [vmem:[%s1062_s7 + $0x178] sm:$0xff]  ;;  %v415_v13 = vadd.f32 %v351_v6, %v287_v5  ;;  %v290_v14 = vld [vmem:[%s1055_s19 + $0x180] sm:$0xff]  ;;  %v416_v16 = vadd.f32 %v352_v9, %v288_v8  ;;  %v291_v17 = vld [vmem:[%s1055_s19 + $0x188] sm:$0xff] }
  0x8b   : > { %463 = vst [vmem:[%s1077_s20 + $0xe8] sm:$0xff] %v399_v29  ;;  %v354_v15 = vld [vmem:[%s1062_s7 + $0x180] sm:$0xff]  ;;  %v355_v18 = vld [vmem:[%s1062_s7 + $0x188] sm:$0xff]  ;;  %v417_v19 = vadd.f32 %v353_v12, %v289_v11  ;;  %v292_v20 = vld [vmem:[%s1055_s19 + $0x190] sm:$0xff] }
  0x8c   : > { %464 = vst [vmem:[%s1077_s20 + $0xf0] sm:$0xff] %v400_v32  ;;  %v356_v21 = vld [vmem:[%s1062_s7 + $0x190] sm:$0xff]  ;;  %v418_v22 = vadd.f32 %v354_v15, %v290_v14  ;;  %v293_v23 = vld [vmem:[%s1055_s19 + $0x198] sm:$0xff]  ;;  %v419_v25 = vadd.f32 %v355_v18, %v291_v17  ;;  %v294_v26 = vld [vmem:[%s1055_s19 + $0x1a0] sm:$0xff] }
  0x8d   : > { %465 = vst [vmem:[%s1077_s20 + $0xf8] sm:$0xff] %v401_v35  ;;  %v357_v24 = vld [vmem:[%s1062_s7 + $0x198] sm:$0xff]  ;;  %v358_v27 = vld [vmem:[%s1062_s7 + $0x1a0] sm:$0xff]  ;;  %v420_v28 = vadd.f32 %v356_v21, %v292_v20  ;;  %v295_v29 = vld [vmem:[%s1055_s19 + $0x1a8] sm:$0xff] }
  0x8e   : > { %466 = vst [vmem:[%s1077_s20 + $0x100] sm:$0xff] %v402_v38  ;;  %v359_v30 = vld [vmem:[%s1062_s7 + $0x1a8] sm:$0xff]  ;;  %v421_v31 = vadd.f32 %v357_v24, %v293_v23  ;;  %v296_v32 = vld [vmem:[%s1055_s19 + $0x1b0] sm:$0xff]  ;;  %v422_v34 = vadd.f32 %v358_v27, %v294_v26  ;;  %v297_v35 = vld [vmem:[%s1055_s19 + $0x1b8] sm:$0xff] }
  0x8f   : > { %467 = vst [vmem:[%s1077_s20 + $0x108] sm:$0xff] %v403_v41  ;;  %v360_v33 = vld [vmem:[%s1062_s7 + $0x1b0] sm:$0xff]  ;;  %v361_v36 = vld [vmem:[%s1062_s7 + $0x1b8] sm:$0xff]  ;;  %v423_v37 = vadd.f32 %v359_v30, %v295_v29  ;;  %v298_v38 = vld [vmem:[%s1055_s19 + $0x1c0] sm:$0xff] }
  0x90   : > { %468 = vst [vmem:[%s1077_s20 + $0x110] sm:$0xff] %v404_v44  ;;  %v362_v39 = vld [vmem:[%s1062_s7 + $0x1c0] sm:$0xff]  ;;  %v424_v40 = vadd.f32 %v360_v33, %v296_v32  ;;  %v299_v41 = vld [vmem:[%s1055_s19 + $0x1c8] sm:$0xff]  ;;  %v425_v43 = vadd.f32 %v361_v36, %v297_v35  ;;  %v300_v44 = vld [vmem:[%s1055_s19 + $0x1d0] sm:$0xff] }
  0x91   : > { %469 = vst [vmem:[%s1077_s20 + $0x118] sm:$0xff] %v405_v47  ;;  %v363_v42 = vld [vmem:[%s1062_s7 + $0x1c8] sm:$0xff]  ;;  %v364_v45 = vld [vmem:[%s1062_s7 + $0x1d0] sm:$0xff]  ;;  %v426_v46 = vadd.f32 %v362_v39, %v298_v38  ;;  %v301_v47 = vld [vmem:[%s1055_s19 + $0x1d8] sm:$0xff] }
  0x92   : > { %470 = vst [vmem:[%s1077_s20 + $0x120] sm:$0xff] %v406_v50  ;;  %v365_v48 = vld [vmem:[%s1062_s7 + $0x1d8] sm:$0xff]  ;;  %v427_v49 = vadd.f32 %v363_v42, %v299_v41  ;;  %v302_v50 = vld [vmem:[%s1055_s19 + $0x1e0] sm:$0xff]  ;;  %v428_v52 = vadd.f32 %v364_v45, %v300_v44  ;;  %v367_v54 = vld [vmem:[%s1062_s7 + $0x1e8] sm:$0xff] }
  0x93   : > { %471 = vst [vmem:[%s1077_s20 + $0x128] sm:$0xff] %v407_v53  ;;  %v366_v51 = vld [vmem:[%s1062_s7 + $0x1e0] sm:$0xff]  ;;  %v303_v53 = vld [vmem:[%s1055_s19 + $0x1e8] sm:$0xff]  ;;  %v429_v55 = vadd.f32 %v365_v48, %v301_v47  ;;  %v368_v57 = vld [vmem:[%s1062_s7 + $0x1f0] sm:$0xff] }
  0x94   : > { %472 = vst [vmem:[%s1077_s20 + $0x130] sm:$0xff] %v408_v56  ;;  %v304_v56 = vld [vmem:[%s1055_s19 + $0x1f0] sm:$0xff]  ;;  %v430_v58 = vadd.f32 %v366_v51, %v302_v50  ;;  %v369_v60 = vld [vmem:[%s1062_s7 + $0x1f8] sm:$0xff]  ;;  %v431_v61 = vadd.f32 %v367_v54, %v303_v53 }
  0x95   : > { %473 = vst [vmem:[%s1077_s20 + $0x138] sm:$0xff] %v409_v59  ;;  %v305_v59 = vld [vmem:[%s1055_s19 + $0x1f8] sm:$0xff] }
  0x96   : > { %474 = vst [vmem:[%s1077_s20 + $0x140] sm:$0xff] %v410_v62  ;;  %v432_v62 = vadd.f32 %v368_v57, %v304_v56  ;;  %v433_v63 = vadd.f32 %v369_v60, %v305_v59 }
  0x97   : > { %475 = vst [vmem:[%s1077_s20 + $0x148] sm:$0xff] %v411_v1 }
  0x98   : > { %476 = vst [vmem:[%s1077_s20 + $0x150] sm:$0xff] %v412_v4 }
  0x99   : > { %477 = vst [vmem:[%s1077_s20 + $0x158] sm:$0xff] %v413_v7 }
  0x9a   : > { %478 = vst [vmem:[%s1077_s20 + $0x160] sm:$0xff] %v414_v10 }
  0x9b   : > { %479 = vst [vmem:[%s1077_s20 + $0x168] sm:$0xff] %v415_v13 }
  0x9c   : > { %480 = vst [vmem:[%s1077_s20 + $0x170] sm:$0xff] %v416_v16 }
  0x9d   : > { %481 = vst [vmem:[%s1077_s20 + $0x178] sm:$0xff] %v417_v19 }
  0x9e   : > { %482 = vst [vmem:[%s1077_s20 + $0x180] sm:$0xff] %v418_v22 }
  0x9f   : > { %483 = vst [vmem:[%s1077_s20 + $0x188] sm:$0xff] %v419_v25 }
  0xa0   : > { %484 = vst [vmem:[%s1077_s20 + $0x190] sm:$0xff] %v420_v28 }
  0xa1   : > { %485 = vst [vmem:[%s1077_s20 + $0x198] sm:$0xff] %v421_v31 }
  0xa2   : > { %486 = vst [vmem:[%s1077_s20 + $0x1a0] sm:$0xff] %v422_v34 }
  0xa3   : > { %487 = vst [vmem:[%s1077_s20 + $0x1a8] sm:$0xff] %v423_v37 }
  0xa4   : > { %488 = vst [vmem:[%s1077_s20 + $0x1b0] sm:$0xff] %v424_v40 }
  0xa5   : > { %489 = vst [vmem:[%s1077_s20 + $0x1b8] sm:$0xff] %v425_v43 }
  0xa6   : > { %490 = vst [vmem:[%s1077_s20 + $0x1c0] sm:$0xff] %v426_v46 }
  0xa7   : > { %491 = vst [vmem:[%s1077_s20 + $0x1c8] sm:$0xff] %v427_v49 }
  0xa8   : > { %492 = vst [vmem:[%s1077_s20 + $0x1d0] sm:$0xff] %v428_v52 }
  0xa9   : > { %493 = vst [vmem:[%s1077_s20 + $0x1d8] sm:$0xff] %v429_v55  ;;  %505 = sbr.rel (!%p943_p9) target bundleno = 205 (0xcd), region = 40 }
  0xaa   : > { %494 = vst [vmem:[%s1077_s20 + $0x1e0] sm:$0xff] %v430_v58 }
  0xab   : > { %495 = vst [vmem:[%s1077_s20 + $0x1e8] sm:$0xff] %v431_v61 }
  0xac   : > { %496 = vst [vmem:[%s1077_s20 + $0x1f0] sm:$0xff] %v432_v62 }
  0xad   : > { %497 = vst [vmem:[%s1077_s20 + $0x1f8] sm:$0xff] %v433_v63 }
  0xae   : > { %s1347_s23 = smov (!%p508_p6, %s507_s23), 16 }
  0xaf   : > { %s661_s6 = sshll.u32 %s1347_s23, 5 }
  0xb0   : > { %s512_s4 = ssub.s32 512, %s661_s6 }
  0xb1   : > { %s513_s26 = sshll.u32 %s512_s4, 4 }
  0xb2   : > { %514 = vsyncadd %s499_s8, %s513_s26  ;;  %p1271_p5 = scmp.ne.s32.totalorder %s661_s6, 0  ;;  %s663_s30 = sshll.u32 %s916_s13, 9 }
  0xb3   : > { %s518_s17 = scalar_lea.hbm %s1327_s2, %s663_s30  ;;  %s520_s25 = sshll.u32 %s1077_s20, 4  ;;  %s1280_s25 = int_to_ptr.vmem [resolvable:$true] %s520_s25 }
  0xb4   : > { %s522_s28 = sshll.u32 %s518_s17, 4  ;;  %s652_s29 = sshll.u32 %s1347_s23, 9  ;;  %s1282_s28 = int_to_ptr.hbm [resolvable:$true] %s522_s28 }
  0xb5   : > { %s788_s5 = sshra.s32 %s1280_s25, 4  ;;  %s790_s19 = sshrl.u32 %s652_s29, 4  ;;  %s789_s5 = int_to_ptr.vmem [resolvable:$true] %s788_s5 }
  0xb6   : > { %s795_s3 = scalar_lea.vmem %s789_s5, %s790_s19  ;;  %s877_s13 = smov [#allocation7]  }
  0xb7   : > { %p796_p9 = scmp.ne.s32.totalorder %s789_s5, %s795_s3  ;;  %s799_s7 = scalar_lea.vmem %s877_s13, 1024 }
  0xb8   : > { %p801_p8 = scmp.lt.s32.totalorder %s799_s7, %s795_s3 }
  0xb9   : > { %p797_p4 = pnand %p796_p9, %p1271_p5 }
  0xbb   : > { %p798_p7 = pneg %p797_p4 }
  0xbd   : > { %p803_p12 = pnand %p801_p8, %p798_p7 }
  0xbf   : > { %806 = shalt.err (!%p803_p12)
}
  0xc0   : > { %s807_s20 = sshra.s32 %s1282_s28, 4  ;;  %s818_s26 = scalar_lea.hbm %s1327_s2, 992  ;;  %s808_s20 = int_to_ptr.hbm [resolvable:$true] %s807_s20 }
  0xc1   : > { %s814_s27 = scalar_lea.hbm %s808_s20, %s790_s19  ;;  %p819_p11 = scmp.lt.s32.totalorder %s808_s20, %s1327_s2 }
  0xc2   : > { %p815_p0 = scmp.ne.s32.totalorder %s808_s20, %s814_s27  ;;  %p820_p13 = scmp.lt.s32.totalorder %s818_s26, %s814_s27 }
  0xc4   : > { %p816_p1 = pnand %p815_p0, %p1271_p5  ;;  %p821_p2 = por %p820_p13, %p819_p11 }
  0xc6   : > { %p817_p10 = pneg %p816_p1 }
  0xc8   : > { %p822_p3 = pnand %p821_p2, %p817_p10 }
  0xca   : > { %825 = shalt.err (!%p822_p3)
}
  0xcb   : > { %s878_s16 = smov 512   ;;  %s879_s17 = smov 32  }
  0xcc   : > { %528 = dma.vmem_to_hbm [thread:$0]  (%p1271_p5), %s1280_s25, %s652_s29, %s1282_s28, %s499_s8, %s878_s16, %s878_s16, %s879_s17  }
  0xcd PF: > { %s537_s5 = sand.u32 1, %s857_s9   ;;  %p1336_p6 = scmp.ne.s32.totalorder %s1332_s22, 0 }
  0xce   : > { %p1337_p9 = scmp.ge.s32.totalorder %s869_s12, 2  ;;  %s538_s19 = scalar_lea.sflag [#allocation4], %s537_s5 }
  0xd0   : > { %p668_p4 = pnand %p1337_p9, %p1336_p6 }
  0xd2   : > { %p669_p7 = pneg %p668_p4 }
  0xd4   : > { %852 = dma.done.wait (%p669_p7), %s538_s19, 8192  }
  0xd5   : > { %854 = vsyncadd (%p669_p7), %s538_s19, 4294959104  ;;  %p18_p8 = scmp.ge.s32.totalorder %s920_s15, 4   ;;  %s1338_s9 = smov %s861_s10 }
  0xd6   : > { %s1339_s10 = smov %s865_s11  ;;  %s1340_s11 = smov %s932_s18 }
  0xd7   : > { %s1341_s12 = smov %s920_s15  ;;  %20 = sbr.rel (!%p18_p8) target bundleno = 7 (0x7), region = 86 }
  0xdc   :  { %544 = vsyncpa [#allocation3], 1 }
  0xdd   :  { %546 = vsyncpa [#allocation3 + $0x1], 1 }
  0xde   :  { %547 = vsyncpa [#allocation6], 1 }
  0xdf   :  { %549 = vsyncpa [#allocation6 + $0x1], 1 }
  0xe0   :  { %550 = vsyncpa [#allocation4], 1 }
  0xe1   :  { %552 = vsyncpa [#allocation4 + $0x1], 1 }

</bundles_post_ra>
